<compile_context>
chip_gen: v7x
topology: tpu7x:2x2x1
jax: 0.10.0
libtpu: 0.0.40
codegen_flags: <defaults>
</compile_context>

<pallas_src>
import jax
import jax.numpy as jnp
from jax.experimental import pallas as pl
from jax.experimental.pallas import tpu as pltpu


def _se_kernel(x_ref, w1t_ref, b1_ref, w2t_ref, b2_ref, o_ref):
    # x_ref/o_ref: (nb, C, HW)   w1t_ref: (C, Ch)  b1_ref: (1, Ch)
    # w2t_ref: (Ch, C)           b2_ref: (1, C)
    x = x_ref[...]                                        # (nb, C, HW)
    inv_hw = 1.0 / x.shape[-1]                            # Python constant, no divide
    pooled = jnp.sum(x, axis=-1) * inv_hw                 # (nb, C) global avg pool
    h = jnp.dot(pooled, w1t_ref[...],
                preferred_element_type=jnp.float32) + b1_ref[...]   # (nb, Ch)
    h = jnp.maximum(h, 0.0)                               # ReLU
    z = jnp.dot(h, w2t_ref[...],
                preferred_element_type=jnp.float32) + b2_ref[...]   # (nb, C)
    # sigmoid: exp lands on the EUP; approximate reciprocal also on the EUP
    # slot instead of a VPU divide sequence (tiny (nb, C) tensor, free).
    s = pl.reciprocal(1.0 + jnp.exp(-z), approx=True)     # (nb, C)
    o_ref[...] = x * s[:, :, None]                        # broadcast over spatial


def se_forward(x_nchw, w1, b1, w2, b2, *, vmem_block_budget_bytes=12 * 1024 * 1024):
    """x_nchw: (N, C, H, W) f32.  w1: (Ch, C), b1: (Ch,), w2: (C, Ch), b2: (C,)."""
    N, C, H, W = x_nchw.shape
    HW = H * W
    Ch = w1.shape[0]
    x_flat = x_nchw.reshape(N, C, HW)

    # pre-transpose weights so the kernel does plain row-major matmuls
    w1t = jnp.transpose(w1)            # (C, Ch)
    w2t = jnp.transpose(w2)            # (Ch, C)
    b1_2d = b1.reshape(1, -1)
    b2_2d = b2.reshape(1, -1)

    # Choose how many images per grid step: x block + out block, each
    # double-buffered -> ~4 live copies of a block in VMEM.
    itemsize = jnp.dtype(x_nchw.dtype).itemsize
    per_image_bytes = C * HW * itemsize
    nb = int(max(1, vmem_block_budget_bytes // (4 * per_image_bytes)))
    nb = int(min(nb, N))
    # TODO(synk): if a single image exceeds the VMEM budget (very large C*HW,
    # most relevant on v7x's 64 MiB VMEM), switch to a 2D (N, HW-tile) grid
    # that accumulates the pooled sum in scratch (pl.when init/finalize) and
    # applies the gate in a second streaming pass.

    grid = (pl.cdiv(N, nb),)

    flops = 2 * N * C * HW + 4 * N * C * Ch          # pool + scale + tiny FCs
    bytes_accessed = 2 * N * C * HW * itemsize + (2 * C * Ch + C + Ch) * 4

    out_flat = pl.pallas_call(
        _se_kernel,
        out_shape=jax.ShapeDtypeStruct((N, C, HW), x_nchw.dtype),
        grid_spec=pltpu.PrefetchScalarGridSpec(
            num_scalar_prefetch=0,
            grid=grid,
            in_specs=[
                pl.BlockSpec((nb, C, HW), lambda i: (i, 0, 0)),   # x: streamed
                pl.BlockSpec((C, Ch), lambda i: (0, 0)),          # weights stay resident
                pl.BlockSpec((1, Ch), lambda i: (0, 0)),
                pl.BlockSpec((Ch, C), lambda i: (0, 0)),
                pl.BlockSpec((1, C), lambda i: (0, 0)),
            ],
            out_specs=pl.BlockSpec((nb, C, HW), lambda i: (i, 0, 0)),
        ),
        compiler_params=pltpu.CompilerParams(
            dimension_semantics=("parallel",),        # megacore sharding on v7x
            vmem_limit_bytes=32 * 1024 * 1024,        # explicit, fits all gens
        ),
        cost_estimate=pl.CostEstimate(
            flops=flops, transcendentals=N * C, bytes_accessed=bytes_accessed),
    )(x_flat, w1t, b1_2d, w2t, b2_2d)

    return out_flat.reshape(N, C, H, W)


def init_se_params(key, in_planes):
    """Deterministic init mirroring nn.Linear's uniform(-1/sqrt(fan_in), 1/sqrt(fan_in))."""
    hidden = in_planes // 16
    k1, k2, k3, k4 = jax.random.split(key, 4)
    bound1 = 1.0 / (in_planes ** 0.5)
    bound2 = 1.0 / (hidden ** 0.5)
    w1 = jax.random.uniform(k1, (hidden, in_planes), jnp.float32, -bound1, bound1)
    b1 = jax.random.uniform(k2, (hidden,), jnp.float32, -bound1, bound1)
    w2 = jax.random.uniform(k3, (in_planes, hidden), jnp.float32, -bound2, bound2)
    b2 = jax.random.uniform(k4, (in_planes,), jnp.float32, -bound2, bound2)
    return w1, b1, w2, b2


def _reference(x, w1, b1, w2, b2):
    """Pure-JAX reference of the PyTorch forward for validation."""
    pooled = jnp.mean(x, axis=(2, 3))                       # (N, C)
    h = jnp.maximum(pooled @ w1.T + b1, 0.0)
    s = jax.nn.sigmoid(h @ w2.T + b2)
    return x * s[:, :, None, None]


if __name__ == "__main__":
    key = jax.random.PRNGKey(0)
    kx, kp = jax.random.split(key)

    N, C, H, W = 2, 64, 16, 16       # in_planes=64 -> hidden=4; HW=256 (lane-dense)
    x = jax.random.normal(kx, (N, C, H, W), dtype=jnp.float32)
    w1, b1, w2, b2 = init_se_params(kp, C)

    out = jax.block_until_ready(se_forward(x, w1, b1, w2, b2))
    ref = _reference(x, w1, b1, w2, b2)

    assert out.shape == (N, C, H, W)
    # Tolerance slightly loosened only because the kernel uses the EUP
    # approximate reciprocal inside the sigmoid; structural errors would be O(1).
    assert jnp.allclose(out, ref, atol=5e-3, rtol=5e-3), "mismatch vs reference"

    print("KERNEL_OK")
</pallas_src>

<mosaic_0001>
module attributes {stable_mosaic.version = 11 : i64} {
  func.func @_se_kernel(%arg0: i32, %arg1: memref<2x64x256xf32, #tpu.memory_space<vmem>>, %arg2: memref<64x4xf32, #tpu.memory_space<vmem>>, %arg3: memref<1x4xf32, #tpu.memory_space<vmem>>, %arg4: memref<4x64xf32, #tpu.memory_space<vmem>>, %arg5: memref<1x64xf32, #tpu.memory_space<vmem>>, %arg6: memref<2x64x256xf32, #tpu.memory_space<vmem>>) attributes {dimension_semantics = [#tpu.dimension_semantics<parallel>], iteration_bounds = array<i64: 1>, scalar_prefetch = 0 : i64, scratch_operands = 0 : i64, tpu.core_type = #tpu.core_type<tc>, window_params = [{transform_indices = @transform_0, window_bounds = array<i64: 2, 64, 256>}, {pipeline_mode = #tpu.pipeline_mode<synchronous>, transform_indices = @transform_1, window_bounds = array<i64: 64, 4>}, {pipeline_mode = #tpu.pipeline_mode<synchronous>, transform_indices = @transform_2, window_bounds = array<i64: 1, 4>}, {pipeline_mode = #tpu.pipeline_mode<synchronous>, transform_indices = @transform_3, window_bounds = array<i64: 4, 64>}, {pipeline_mode = #tpu.pipeline_mode<synchronous>, transform_indices = @transform_4, window_bounds = array<i64: 1, 64>}, {transform_indices = @transform_5, window_bounds = array<i64: 2, 64, 256>}]} {
    %c0 = arith.constant 0 : index
    %c0_0 = arith.constant 0 : index
    %c0_1 = arith.constant 0 : index
    %0 = vector.load %arg1[%c0, %c0_0, %c0_1] : memref<2x64x256xf32, #tpu.memory_space<vmem>>, vector<2x64x256xf32>
    %cst = arith.constant dense<0.000000e+00> : vector<2x64xf32>
    %1 = vector.multi_reduction <add>, %0, %cst [2] : vector<2x64x256xf32> to vector<2x64xf32>
    %cst_2 = arith.constant 3.906250e-03 : f32
    %2 = vector.broadcast %cst_2 : f32 to vector<2x64xf32>
    %3 = arith.mulf %1, %2 : vector<2x64xf32>
    %c0_3 = arith.constant 0 : index
    %c0_4 = arith.constant 0 : index
    %4 = vector.load %arg2[%c0_3, %c0_4] : memref<64x4xf32, #tpu.memory_space<vmem>>, vector<64x4xf32>
    %cst_5 = arith.constant dense<0.000000e+00> : vector<2x4xf32>
    %5 = tpu.matmul %3, %4, %cst_5 {dimension_numbers = #tpu.dot_dimension_numbers<[1], [0], [0], [1], [0, 0, 1, 1], [], []>} : vector<2x64xf32>, vector<64x4xf32>, vector<2x4xf32> -> vector<2x4xf32>
    %c0_6 = arith.constant 0 : index
    %c0_7 = arith.constant 0 : index
    %6 = vector.load %arg3[%c0_6, %c0_7] : memref<1x4xf32, #tpu.memory_space<vmem>>, vector<1x4xf32>
    %7 = vector.broadcast %6 : vector<1x4xf32> to vector<2x4xf32>
    %8 = arith.addf %5, %7 : vector<2x4xf32>
    %cst_8 = arith.constant 0.000000e+00 : f32
    %9 = vector.broadcast %cst_8 : f32 to vector<2x4xf32>
    %10 = arith.maximumf %8, %9 : vector<2x4xf32>
    %c0_9 = arith.constant 0 : index
    %c0_10 = arith.constant 0 : index
    %11 = vector.load %arg4[%c0_9, %c0_10] : memref<4x64xf32, #tpu.memory_space<vmem>>, vector<4x64xf32>
    %cst_11 = arith.constant dense<0.000000e+00> : vector<2x64xf32>
    %12 = tpu.matmul %10, %11, %cst_11 {dimension_numbers = #tpu.dot_dimension_numbers<[1], [0], [0], [1], [0, 0, 1, 1], [], []>} : vector<2x4xf32>, vector<4x64xf32>, vector<2x64xf32> -> vector<2x64xf32>
    %c0_12 = arith.constant 0 : index
    %c0_13 = arith.constant 0 : index
    %13 = vector.load %arg5[%c0_12, %c0_13] : memref<1x64xf32, #tpu.memory_space<vmem>>, vector<1x64xf32>
    %14 = vector.broadcast %13 : vector<1x64xf32> to vector<2x64xf32>
    %15 = arith.addf %12, %14 : vector<2x64xf32>
    %cst_14 = arith.constant 0.000000e+00 : f32
    %16 = vector.broadcast %cst_14 : f32 to vector<2x64xf32>
    %17 = arith.subf %16, %15 : vector<2x64xf32>
    %18 = math.exp %17 : vector<2x64xf32>
    %cst_15 = arith.constant 1.000000e+00 : f32
    %19 = vector.broadcast %cst_15 : f32 to vector<2x64xf32>
    %20 = arith.addf %19, %18 : vector<2x64xf32>
    %21 = tpu.reciprocal %20 {approx = true} : vector<2x64xf32> -> vector<2x64xf32>
    %22 = vector.shape_cast %21 : vector<2x64xf32> to vector<2x64x1xf32>
    %23 = vector.broadcast %22 : vector<2x64x1xf32> to vector<2x64x256xf32>
    %24 = arith.mulf %0, %23 : vector<2x64x256xf32>
    %c0_16 = arith.constant 0 : index
    %c0_17 = arith.constant 0 : index
    %c0_18 = arith.constant 0 : index
    %25 = vector.load %arg6[%c0_16, %c0_17, %c0_18] : memref<2x64x256xf32, #tpu.memory_space<vmem>>, vector<2x64x256xf32>
    tpu.vector_store %arg6[%c0_16, %c0_17, %c0_18], %24 {strides = array<i32>} : memref<2x64x256xf32, #tpu.memory_space<vmem>>, vector<2x64x256xf32>,
    return
  }
  func.func @transform_0(%arg0: i32) -> (i32, i32, i32) {
    %c0_i32 = arith.constant 0 : i32
    %c0_i32_0 = arith.constant 0 : i32
    %c0_i32_1 = arith.constant 0 : i32
    return %arg0, %c0_i32, %c0_i32_0 : i32, i32, i32
  }
  func.func @transform_1(%arg0: i32) -> (i32, i32) {
    %c0_i32 = arith.constant 0 : i32
    %c0_i32_0 = arith.constant 0 : i32
    %c0_i32_1 = arith.constant 0 : i32
    return %c0_i32, %c0_i32_0 : i32, i32
  }
  func.func @transform_2(%arg0: i32) -> (i32, i32) {
    %c0_i32 = arith.constant 0 : i32
    %c0_i32_0 = arith.constant 0 : i32
    %c0_i32_1 = arith.constant 0 : i32
    return %c0_i32, %c0_i32_0 : i32, i32
  }
  func.func @transform_3(%arg0: i32) -> (i32, i32) {
    %c0_i32 = arith.constant 0 : i32
    %c0_i32_0 = arith.constant 0 : i32
    %c0_i32_1 = arith.constant 0 : i32
    return %c0_i32, %c0_i32_0 : i32, i32
  }
  func.func @transform_4(%arg0: i32) -> (i32, i32) {
    %c0_i32 = arith.constant 0 : i32
    %c0_i32_0 = arith.constant 0 : i32
    %c0_i32_1 = arith.constant 0 : i32
    return %c0_i32, %c0_i32_0 : i32, i32
  }
  func.func @transform_5(%arg0: i32) -> (i32, i32, i32) {
    %c0_i32 = arith.constant 0 : i32
    %c0_i32_0 = arith.constant 0 : i32
    %c0_i32_1 = arith.constant 0 : i32
    return %arg0, %c0_i32, %c0_i32_0 : i32, i32, i32
  }
}

</mosaic_0001>

<bundles_post_ra>
// kernel: tpu_custom_call.1
= control target key start
LH: loop header
LB: loop body
LE: loop exit
PB: predicated region body
PF: predicated region fallthrough
CT: control target
= control target key end

     0   :  { %10 = vsyncpa [#allocation3], 0  ;;  %s937_s0 = inlined_call_operand.hbm [shape: f32[2,64,256], index: 0, kind: input, shape index: {}]   ;;  %s938_s1 = inlined_call_operand.vmem [shape: f32[64,4], index: 1, kind: input, shape index: {}]   ;;  %s939_s2 = inlined_call_operand.vmem [shape: f32[1,4], index: 2, kind: input, shape index: {}]   ;;  %s940_s3 = inlined_call_operand.vmem [shape: f32[4,64], index: 3, kind: input, shape index: {}]   ;;  %s941_s4 = inlined_call_operand.vmem [shape: f32[1,64], index: 4, kind: input, shape index: {}]   ;;  %s942_s5 = inlined_call_operand.hbm [shape: f32[2,64,256], index: 5, kind: output, shape index: {}]  }
   0x1   :  { %11 = vsyncpa [#allocation4], 0  ;;  %s685_s18 = smov [#allocation2]   ;;  %s637_s22 = scalar_lea.hbm %s937_s0, 4096 }
   0x2   :  { %s17_s19 = sshll.u32 %s685_s18, 4  ;;  %p638_p0 = scmp.ne.s32.totalorder %s937_s0, %s637_s22  ;;  %s18_s19 = int_to_ptr.vmem [resolvable:$true] %s17_s19 }
   0x3   :  { %p641_p1 = scmp.lt.u32.totalorder %s637_s22, %s937_s0 }
   0x5   :  { %p643_p2 = pnand %p641_p1, %p638_p0 }
   0x7   :  { %646 = shalt.err (!%p643_p2)
}
   0x8   :  { %s647_s27 = scalar_lea.vmem %s18_s19, 4096  ;;  %p652_p4 = scmp.lt.s32.totalorder %s18_s19, %s18_s19 }
   0x9   :  { %p648_p3 = scmp.ne.s32.totalorder %s18_s19, %s647_s27  ;;  %p653_p5 = scmp.lt.s32.totalorder %s647_s27, %s647_s27 }
   0xb   :  { %p654_p6 = por %p653_p5, %p652_p4 }
   0xd   :  { %p655_p7 = pnand %p654_p6, %p648_p3 }
   0xf   :  { %658 = shalt.err (!%p655_p7)
}
  0x10   :  { %s686_s28 = smov 256   ;;  %s687_s29 = smov 16  }
  0x11   :  { %23 = dma.hbm_to_vmem [thread:$0]  %s937_s0, 4096, %s18_s19, [#allocation3], %s686_s28, %s686_s28, %s687_s29  }
  0x12   :  { %681 = dma.done.wait [#allocation3], 4096  }
  0x13   :  { %682 = vsyncadd [#allocation3], 4294963200  ;;  %v737_v0 = vld [vmem:[#allocation2 + $0x80] sm:$0xff]  ;;  %v739_v1 = vld [vmem:[#allocation2 + $0x88] sm:$0xff]  ;;  %v688_v51 = vmov 0.0|0.0   ;;  %vm689_vm0 = vmmov 0  }
  0x14   :  { %v741_v2 = vld [vmem:[#allocation2] sm:$0xff]  ;;  %v91_v3 = vadd.f32 %v739_v1, %v737_v0  ;;  %v745_v4 = vld [vmem:[#allocation2 + $0x8] sm:$0xff]  ;;  %v747_v5 = vld [vmem:[#allocation2 + $0x90] sm:$0xff]  ;;  %614 = vmatprep.subr.bf16.mxu0 %v688_v51  ;;  %v690_v61 = vmov 0.0   ;;  %vm173_vm1 = vcmask 130112   ;;  %vm180_vm2 = vcmask 195712  }
  0x15   :  { %v749_v6 = vld [vmem:[#allocation2 + $0x98] sm:$0xff]  ;;  %v67_v7 = vadd.f32 %v745_v4, %v741_v2  ;;  %v753_v8 = vld [vmem:[#allocation2 + $0x10] sm:$0xff]  ;;  %v761_v12 = vld [vmem:[#allocation2 + $0xa0] sm:$0xff]  ;;  %606 = vmatprep.mubr.msk.f32.mxu0 %vm689_vm0, %v690_v61  ;;  %609 = vmatprep.subr.mxu1 %v690_v61  ;;  %vm187_vm3 = vcmask 261312   ;;  %vm194_vm4 = vcmask 326912   ;;  %vm201_vm5 = vcmask 392512  }
  0x16   :  { %v755_v9 = vld [vmem:[#allocation2 + $0x18] sm:$0xff]  ;;  %92 = vadd.xlane.f32.xlu1 %v91_v3  ;;  %v94_v10 = vadd.f32 %v749_v6, %v747_v5  ;;  %v763_v13 = vld [vmem:[#allocation2 + $0xa8] sm:$0xff]  ;;  %v765_v14 = vld [vmem:[#allocation2 + $0x20] sm:$0xff]  ;;  %611 = vmatprep.mubr.msk.f32.mxu1 %vm689_vm0, %v690_v61  ;;  %vm208_vm6 = vcmask 458112   ;;  %vm215_vm7 = vcmask 523712   ;;  %vm256_vm8 = vcmask 1041409  }
  0x17   :  { %68 = vadd.xlane.f32.xlu0 %v67_v7  ;;  %v70_v11 = vadd.f32 %v755_v9, %v753_v8  ;;  %v767_v15 = vld [vmem:[#allocation2 + $0x28] sm:$0xff]  ;;  %v97_v16 = vadd.f32 %v763_v13, %v761_v12  ;;  %v773_v18 = vld [vmem:[#allocation2 + $0xb0] sm:$0xff]  ;;  %v775_v19 = vld [vmem:[#allocation2 + $0xb8] sm:$0xff]  ;;  %vm258_vm9 = vcmask 523264   ;;  %vm344_vm10 = vcmask 1043456  }
  0x18   :  { %v73_v17 = vadd.f32 %v767_v15, %v765_v14  ;;  %950 = vst [vmem:[#allocation8_spill] sm:$0xff] %v775_v19  ;;  %v777_v20 = vld [vmem:[#allocation2 + $0x30] sm:$0xff]  ;;  %v779_v21 = vld [vmem:[#allocation2 + $0x38] sm:$0xff]  ;;  %v100_v22 = vadd.f32 %v775_v19, %v773_v18  ;;  %v785_v24 = vld [vmem:[#allocation2 + $0xc0] sm:$0xff]  ;;  %vm340_vm11 = vcmask 31744  }
  0x19   :  { %v76_v23 = vadd.f32 %v779_v21, %v777_v20  ;;  %v787_v25 = vld [vmem:[#allocation2 + $0xc8] sm:$0xff]  ;;  %v789_v26 = vld [vmem:[#allocation2 + $0x40] sm:$0xff]  ;;  %v797_v30 = vld [vmem:[#allocation2 + $0xd0] sm:$0xff] }
  0x1a   :  { %95 = vadd.xlane.f32.xlu1 %v94_v10  ;;  %v791_v27 = vld [vmem:[#allocation2 + $0x48] sm:$0xff]  ;;  %v103_v28 = vadd.f32 %v787_v25, %v785_v24  ;;  %951 = vst [vmem:[#allocation9_spill] sm:$0xff] %v797_v30  ;;  %v799_v31 = vld [vmem:[#allocation2 + $0xd8] sm:$0xff]  ;;  %v801_v32 = vld [vmem:[#allocation2 + $0x50] sm:$0xff]  ;;  %v162_v10 = vlaneseq }
  0x1b   :  { %71 = vadd.xlane.f32.xlu0 %v70_v11  ;;  %v79_v29 = vadd.f32 %v791_v27, %v789_v26  ;;  %952 = vst [vmem:[#allocation10_spill] sm:$0xff] %v799_v31  ;;  %v803_v33 = vld [vmem:[#allocation2 + $0x58] sm:$0xff]  ;;  %v106_v34 = vadd.f32 %v799_v31, %v797_v30  ;;  %v809_v36 = vld [vmem:[#allocation2 + $0xe0] sm:$0xff]  ;;  %v811_v37 = vld [vmem:[#allocation2 + $0xe8] sm:$0xff] }
  0x1c   :  { %v82_v35 = vadd.f32 %v803_v33, %v801_v32  ;;  %953 = vst [vmem:[#allocation11_spill] sm:$0xff] %v809_v36  ;;  %954 = vst [vmem:[#allocation12_spill] sm:$0xff] %v811_v37  ;;  %v813_v38 = vld [vmem:[#allocation2 + $0x60] sm:$0xff]  ;;  %v815_v39 = vld [vmem:[#allocation2 + $0x68] sm:$0xff]  ;;  %v109_v40 = vadd.f32 %v811_v37, %v809_v36 }
  0x1d   :  { %v85_v41 = vadd.f32 %v815_v39, %v813_v38  ;;  %v821_v42 = vld [vmem:[#allocation2 + $0xf0] sm:$0xff]  ;;  %v823_v43 = vld [vmem:[#allocation2 + $0xf8] sm:$0xff]  ;;  %v131_v48 = vld [vmem:[%s938_s1] sm:$0xff] }
  0x1e   :  { %98 = vadd.xlane.f32.xlu1 %v97_v16  ;;  %955 = vst [vmem:[#allocation13_spill] sm:$0xff] %v821_v42  ;;  %956 = vst [vmem:[#allocation14_spill] sm:$0xff] %v823_v43  ;;  %v825_v44 = vld [vmem:[#allocation2 + $0x70] sm:$0xff]  ;;  %v827_v45 = vld [vmem:[#allocation2 + $0x78] sm:$0xff]  ;;  %v112_v46 = vadd.f32 %v823_v43, %v821_v42 }
  0x1f   :  { %74 = vadd.xlane.f32.xlu0 %v73_v17  ;;  %v88_v47 = vadd.f32 %v827_v45, %v825_v44  ;;  %v132_v49 = vld [vmem:[%s938_s1 + $0x8] sm:$0xff]  ;;  %v133_v52 = vld [vmem:[%s938_s1 + $0x10] sm:$0xff]  ;;  %v134_v53 = vld [vmem:[%s938_s1 + $0x18] sm:$0xff]  ;;  %v163_v17 = vand.u32 127, %v162_v10 }
  0x20   :  { %v615_v50 = vpack.c.bf16 %v132_v49, %v131_v48  ;;  %v618_v54 = vpack.c.bf16 %v134_v53, %v133_v52  ;;  %v135_v55 = vld [vmem:[%s938_s1 + $0x20] sm:$0xff]  ;;  %v136_v56 = vld [vmem:[%s938_s1 + $0x28] sm:$0xff]  ;;  %v137_v58 = vld [vmem:[%s938_s1 + $0x30] sm:$0xff] }
  0x21   :  { %v621_v57 = vpack.c.bf16 %v136_v56, %v135_v55  ;;  %v138_v59 = vld [vmem:[%s938_s1 + $0x38] sm:$0xff] }
  0x22   :  { %101 = vadd.xlane.f32.xlu1 %v100_v22  ;;  %616 = vmatpush3.bf16.msra.mxu0 %v615_v50  ;;  %v624_v60 = vpack.c.bf16 %v138_v59, %v137_v58 }
  0x23   :  { %77 = vadd.xlane.f32.xlu0 %v76_v23  ;;  %617 = vmatprep.subr.bf16.mxu0 %v688_v51  ;;  %v857_v23 = vshrl.u32 %v162_v10, 7 }
  0x26   :  { %104 = vadd.xlane.f32.xlu1 %v103_v28  ;;  %619 = vmatpush3.bf16.msra.mxu0 %v618_v54 }
  0x27   :  { %80 = vadd.xlane.f32.xlu0 %v79_v29  ;;  %620 = vmatprep.subr.bf16.mxu0 %v688_v51  ;;  %v168_v29 = vadd.s32 4294967288, %v163_v17 }
  0x29   :  { %v171_v49 = vsub.s32 %v168_v29, %v857_v23 }
  0x2a   :  { %107 = vadd.xlane.f32.xlu1 %v106_v34  ;;  %622 = vmatpush3.bf16.msra.mxu0 %v621_v57  ;;  %v175_v34 = vadd.s32 4294967280, %v163_v17 }
  0x2b   :  { %83 = vadd.xlane.f32.xlu0 %v82_v35  ;;  %623 = vmatprep.subr.bf16.mxu0 %v688_v51  ;;  %v182_v35 = vadd.s32 4294967272, %v163_v17  ;;  %v203_v51 = vadd.s32 4294967248, %v163_v17 }
  0x2c   :  { %v178_v50 = vsub.s32 %v175_v34, %v857_v23 }
  0x2d   :  { %v185_v53 = vsub.s32 %v182_v35, %v857_v23 }
  0x2e   :  { %110 = vadd.xlane.f32.xlu1 %v109_v40  ;;  %625 = vmatpush3.bf16.msra.mxu0 %v624_v60  ;;  %v189_v40 = vadd.s32 4294967264, %v163_v17 }
  0x2f   :  { %86 = vadd.xlane.f32.xlu0 %v85_v41 }
  0x30   :  { %v192_v54 = vsub.s32 %v189_v40, %v857_v23  ;;  %v210_v40 = vadd.s32 4294967240, %v163_v17 }
  0x32   :  { %113 = vadd.xlane.f32.xlu1 %v112_v46  ;;  %v196_v46 = vadd.s32 4294967256, %v163_v17 }
  0x33   :  { %89 = vadd.xlane.f32.xlu0 %v88_v47  ;;  %v166_v47 = vsub.s32 %v163_v17, %v857_v23  ;;  %v213_v17 = vsub.s32 %v210_v40, %v857_v23  ;;  %v574_v40 = vld [vmem:[%s939_s2] ss:$0 sm:$0xff]  ;;  %s691_s2 = smov [#allocation5]  }
  0x34   :  { %v199_v57 = vsub.s32 %v196_v46, %v857_v23 }
  0xa3   :  { %v93_v62 = vpop.xlane.xlu1 %92 }
  0xa4   :  { %v69_v63 = vpop.xlane.xlu0 %68  ;;  %v123_v59 = vmul.f32 0.00390625, %v93_v62 }
  0xa5   :  { %v115_v29 = vmul.f32 0.00390625, %v69_v63 }
  0xa6   :  { %v220_v37 = vrot.slane %v123_v59, %v166_v47 }
  0xa7   :  { %v96_v3 = vpop.xlane.xlu1 %95  ;;  %v167_v19 = vrot.slane %v115_v29, %v166_v47 }
  0xa8   :  { %v72_v7 = vpop.xlane.xlu0 %71  ;;  %v124_v52 = vmul.f32 0.00390625, %v96_v3  ;;  %v206_v3 = vsub.s32 %v203_v51, %v857_v23 }
  0xa9   :  { %v116_v55 = vmul.f32 0.00390625, %v72_v7 }
  0xaa   :  { %v224_v35 = vrot.slane %v124_v52, %v171_v49 }
  0xab   :  { %v99_v11 = vpop.xlane.xlu1 %98  ;;  %v172_v7 = vrot.slane %v116_v55, %v171_v49 }
  0xac   :  { %v75_v16 = vpop.xlane.xlu0 %74  ;;  %v125_v56 = vmul.f32 0.00390625, %v99_v11  ;;  %v225_v51 = vsel %vm173_vm1, %v224_v35, %v220_v37  ;;  %v332_v35 = vld [vmem:[%s940_s3] sm:$0xf]  ;;  %s562_s3 = sshll.u32 %s691_s2, 4  ;;  %s563_s3 = int_to_ptr.vmem [resolvable:$true] %s562_s3 }
  0xad   :  { %v117_v60 = vmul.f32 0.00390625, %v75_v16  ;;  %v174_v49 = vsel %vm173_vm1, %v172_v7, %v167_v19  ;;  %610 = vmatpush3.msk.msra.mxu1 %vm344_vm10, %v332_v35  ;;  %p664_p9 = scmp.lt.s32.totalorder %s563_s3, %s563_s3 }
  0xae   :  { %v229_v11 = vrot.slane %v125_v56, %v178_v50 }
  0xaf   :  { %v102_v22 = vpop.xlane.xlu1 %101  ;;  %v179_v62 = vrot.slane %v117_v60, %v178_v50 }
  0xb0   :  { %v78_v28 = vpop.xlane.xlu0 %77  ;;  %v126_v61 = vmul.f32 0.00390625, %v102_v22  ;;  %v230_v55 = vsel %vm180_vm2, %v229_v11, %v225_v51 }
  0xb1   :  { %v118_v34 = vmul.f32 0.00390625, %v78_v28  ;;  %v181_v59 = vsel %vm180_vm2, %v179_v62, %v174_v49 }
  0xb2   :  { %v234_v16 = vrot.slane %v126_v61, %v185_v53 }
  0xb3   :  { %v105_v41 = vpop.xlane.xlu1 %104  ;;  %v186_v63 = vrot.slane %v118_v34, %v185_v53 }
  0xb4   :  { %v81_v48 = vpop.xlane.xlu0 %80  ;;  %v127_v43 = vmul.f32 0.00390625, %v105_v41  ;;  %v235_v47 = vsel %vm187_vm3, %v234_v16, %v230_v55  ;;  %v576_v16 = vld [vmem:[%s941_s4] ss:$0 sm:$0xff]  ;;  %s659_s4 = scalar_lea.vmem %s563_s3, 4096 }
  0xb5   :  { %v119_v42 = vmul.f32 0.00390625, %v81_v48  ;;  %v188_v37 = vsel %vm187_vm3, %v186_v63, %v181_v59  ;;  %p660_p8 = scmp.ne.s32.totalorder %s563_s3, %s659_s4  ;;  %p665_p10 = scmp.lt.s32.totalorder %s659_s4, %s659_s4 }
  0xb6   :  { %v239_v28 = vrot.slane %v127_v43, %v192_v54 }
  0xb7   :  { %v108_v58 = vpop.xlane.xlu1 %107  ;;  %v193_v52 = vrot.slane %v119_v42, %v192_v54  ;;  %p666_p11 = por %p665_p10, %p664_p9 }
  0xb8   :  { %v84_v10 = vpop.xlane.xlu0 %83  ;;  %v128_v31 = vmul.f32 0.00390625, %v108_v58 }
  0xb9   :  { %v120_v30 = vmul.f32 0.00390625, %v84_v10  ;;  %v195_v19 = vsel %vm194_vm4, %v193_v52, %v188_v37  ;;  %p667_p12 = pnand %p666_p11, %p660_p8 }
  0xba   :  { %v244_v48 = vrot.slane %v128_v31, %v199_v57  ;;  %v240_v31 = vsel %vm194_vm4, %v239_v28, %v235_v47 }
  0xbb   :  { %v111_v46 = vpop.xlane.xlu1 %110  ;;  %v200_v56 = vrot.slane %v120_v30, %v199_v57 }
  0xbc   :  { %v129_v22 = vmul.f32 0.00390625, %v111_v46  ;;  %v87_v36 = vpop.xlane.xlu0 %86  ;;  %v245_v54 = vsel %vm201_vm5, %v244_v48, %v240_v31 }
  0xbd   :  { %v121_v41 = vmul.f32 0.00390625, %v87_v36  ;;  %v202_v57 = vsel %vm201_vm5, %v200_v56, %v195_v19  ;;  %v460_v56 = vsub.s32 1, %v857_v23 }
  0xbe   :  { %v249_v58 = vrot.slane %v129_v22, %v206_v3 }
  0xbf   :  { %v114_v50 = vpop.xlane.xlu1 %113  ;;  %v207_v53 = vrot.slane %v121_v41, %v206_v3 }
  0xc0   :  { %v130_v43 = vmul.f32 0.00390625, %v114_v50  ;;  %v90_v36 = vpop.xlane.xlu0 %89  ;;  %v250_v60 = vsel %vm208_vm6, %v249_v58, %v245_v54 }
  0xc1   :  { %v122_v42 = vmul.f32 0.00390625, %v90_v36  ;;  %v209_v10 = vsel %vm208_vm6, %v207_v53, %v202_v57 }
  0xc2   :  { %v254_v30 = vrot.slane %v130_v43, %v213_v17 }
  0xc3   :  { %v214_v61 = vrot.slane %v122_v42, %v213_v17  ;;  %v425_v17 = vsub.s32 0, %v857_v23 }
  0xc4   :  { %v255_v29 = vsel %vm215_vm7, %v254_v30, %v250_v60 }
  0xc5   :  { %v216_v34 = vsel %vm215_vm7, %v214_v61, %v209_v10 }
  0xc6   :  { %v257_v3 = vsel %vm256_vm8, %v255_v29, %v216_v34 }
  0xc7   :  { %607 = vmatmul.mubr.msk.f32.vlgmr.msra.gmra.mrb[0].mxu0 %vm258_vm9, %v257_v3  ;;  %v957_v3 = vld [vmem:[#allocation8_spill] sm:$0xff] }
 0x19a   :  { %v327_v7 = vpop.f32.mrb[0].mxu0 }
 0x19b   :  { %v328_v11 = vadd.f32 %v574_v40, %v327_v7  ;;  %v608_v46 = vpop.f32.mrb[1].mxu0  ;;  %v958_v40 = vld [vmem:[#allocation11_spill] sm:$0xff] }
 0x19c   :  { %v961_v46 = vld [vmem:[#allocation10_spill] sm:$0xff] }
 0x19d   :  { %v331_v62 = vmax.f32 %v328_v11, 0.0  ;;  %v959_v11 = vld [vmem:[#allocation12_spill] sm:$0xff] }
 0x19f   :  { %612 = vmatmul.mubr.msk.f32.vlgmr.msra.gmra.mrb[0].mxu1 %vm340_vm11, %v331_v62 }
 0x272   :  { %v414_v22 = vpop.f32.mrb[0].mxu1 }
 0x273   :  { %v415_v63 = vadd.f32 %v576_v16, %v414_v22  ;;  %v613_v28 = vpop.f32.mrb[1].mxu1  ;;  %v962_v16 = vld [vmem:[#allocation13_spill] sm:$0xff] }
 0x275   :  { %v418_v41 = vsub.f32 0.0, %v415_v63  ;;  %v963_v63 = vld [vmem:[#allocation14_spill] sm:$0xff] }
 0x277   :  { %v419_v51 = vmul.f32 1.442695, %v418_v41 }
 0x279   :  { %633 = vpow2.f32 %v419_v51 }
 0x283   :  { %v634_v52 = vpop.eup %633 }
 0x284   :  { %v421_v48 = vadd.f32 1.0, %v634_v52 }
 0x286   :  { %635 = vrcp.f32 %v421_v48 }
 0x290   :  { %v636_v49 = vpop.eup %635 }
 0x291   :  { %v426_v55 = vrot.slane %v636_v49, %v425_v17  ;;  %v461_v58 = vrot.slane %v636_v49, %v460_v56 }
 0x293   :  { %432 = vbcast.lane.b32.xlu1 %v426_v55, 264  ;;  %428 = vbcast.lane.b32.xlu0 %v426_v55, 256 }
 0x297   :  { %436 = vbcast.lane.b32.xlu1 %v426_v55, 272  ;;  %444 = vbcast.lane.b32.xlu0 %v426_v55, 288 }
 0x29b   :  { %440 = vbcast.lane.b32.xlu1 %v426_v55, 280  ;;  %452 = vbcast.lane.b32.xlu0 %v426_v55, 304 }
 0x29f   :  { %448 = vbcast.lane.b32.xlu1 %v426_v55, 296  ;;  %463 = vbcast.lane.b32.xlu0 %v461_v58, 256 }
 0x2a3   :  { %456 = vbcast.lane.b32.xlu1 %v426_v55, 312  ;;  %471 = vbcast.lane.b32.xlu0 %v461_v58, 272 }
 0x2a7   :  { %467 = vbcast.lane.b32.xlu1 %v461_v58, 264  ;;  %479 = vbcast.lane.b32.xlu0 %v461_v58, 288 }
 0x2ab   :  { %475 = vbcast.lane.b32.xlu1 %v461_v58, 280  ;;  %487 = vbcast.lane.b32.xlu0 %v461_v58, 304 }
 0x2af   :  { %483 = vbcast.lane.b32.xlu1 %v461_v58, 296 }
 0x2b3   :  { %491 = vbcast.lane.b32.xlu1 %v461_v58, 312 }
 0x305   :  { %v433_v50 = vpop.permute.xlu1 %432  ;;  %v429_v59 = vpop.permute.xlu0 %428 }
 0x306   :  { %v495_v47 = vmul.f32 %v433_v50, %v753_v8  ;;  %v496_v53 = vmul.f32 %v433_v50, %v755_v9  ;;  %v493_v23 = vmul.f32 %v429_v59, %v741_v2  ;;  %v494_v43 = vmul.f32 %v429_v59, %v745_v4 }
 0x308   :  { %527 = vst [vmem:[#allocation5 + $0x10] sm:$0xff] %v495_v47  ;;  %528 = vst [vmem:[#allocation5 + $0x18] sm:$0xff] %v496_v53 }
 0x309   :  { %525 = vst [vmem:[#allocation5] sm:$0xff] %v493_v23  ;;  %526 = vst [vmem:[#allocation5 + $0x8] sm:$0xff] %v494_v43  ;;  %v437_v36 = vpop.permute.xlu1 %436  ;;  %v445_v37 = vpop.permute.xlu0 %444 }
 0x30a   :  { %v497_v31 = vmul.f32 %v437_v36, %v765_v14  ;;  %v498_v42 = vmul.f32 %v437_v36, %v767_v15  ;;  %v501_v19 = vmul.f32 %v445_v37, %v789_v26  ;;  %v502_v8 = vmul.f32 %v445_v37, %v791_v27 }
 0x30c   :  { %529 = vst [vmem:[#allocation5 + $0x20] sm:$0xff] %v497_v31  ;;  %530 = vst [vmem:[#allocation5 + $0x28] sm:$0xff] %v498_v42 }
 0x30d   :  { %533 = vst [vmem:[#allocation5 + $0x40] sm:$0xff] %v501_v19  ;;  %534 = vst [vmem:[#allocation5 + $0x48] sm:$0xff] %v502_v8  ;;  %v441_v2 = vpop.permute.xlu1 %440  ;;  %v453_v4 = vpop.permute.xlu0 %452 }
 0x30e   :  { %v499_v9 = vmul.f32 %v441_v2, %v777_v20  ;;  %v500_v54 = vmul.f32 %v441_v2, %v779_v21  ;;  %v505_v30 = vmul.f32 %v453_v4, %v813_v38  ;;  %v506_v14 = vmul.f32 %v453_v4, %v815_v39 }
 0x310   :  { %531 = vst [vmem:[#allocation5 + $0x30] sm:$0xff] %v499_v9  ;;  %532 = vst [vmem:[#allocation5 + $0x38] sm:$0xff] %v500_v54 }
 0x311   :  { %537 = vst [vmem:[#allocation5 + $0x60] sm:$0xff] %v505_v30  ;;  %538 = vst [vmem:[#allocation5 + $0x68] sm:$0xff] %v506_v14  ;;  %v449_v15 = vpop.permute.xlu1 %448  ;;  %v464_v26 = vpop.permute.xlu0 %463 }
 0x312   :  { %v503_v27 = vmul.f32 %v449_v15, %v801_v32  ;;  %v504_v57 = vmul.f32 %v449_v15, %v803_v33  ;;  %v509_v60 = vmul.f32 %v464_v26, %v737_v0  ;;  %v510_v20 = vmul.f32 %v464_v26, %v739_v1 }
 0x314   :  { %535 = vst [vmem:[#allocation5 + $0x50] sm:$0xff] %v503_v27  ;;  %536 = vst [vmem:[#allocation5 + $0x58] sm:$0xff] %v504_v57 }
 0x315   :  { %541 = vst [vmem:[#allocation5 + $0x80] sm:$0xff] %v509_v60  ;;  %542 = vst [vmem:[#allocation5 + $0x88] sm:$0xff] %v510_v20  ;;  %v457_v21 = vpop.permute.xlu1 %456  ;;  %v472_v38 = vpop.permute.xlu0 %471 }
 0x316   :  { %v507_v39 = vmul.f32 %v457_v21, %v825_v44  ;;  %v508_v61 = vmul.f32 %v457_v21, %v827_v45  ;;  %v513_v10 = vmul.f32 %v472_v38, %v761_v12  ;;  %v514_v32 = vmul.f32 %v472_v38, %v763_v13 }
 0x318   :  { %539 = vst [vmem:[#allocation5 + $0x70] sm:$0xff] %v507_v39  ;;  %540 = vst [vmem:[#allocation5 + $0x78] sm:$0xff] %v508_v61 }
 0x319   :  { %545 = vst [vmem:[#allocation5 + $0xa0] sm:$0xff] %v513_v10  ;;  %546 = vst [vmem:[#allocation5 + $0xa8] sm:$0xff] %v514_v32  ;;  %v468_v0 = vpop.permute.xlu1 %467  ;;  %v480_v1 = vpop.permute.xlu0 %479 }
 0x31a   :  { %v511_v33 = vmul.f32 %v468_v0, %v747_v5  ;;  %v512_v29 = vmul.f32 %v468_v0, %v749_v6  ;;  %v517_v34 = vmul.f32 %v480_v1, %v785_v24  ;;  %v518_v44 = vmul.f32 %v480_v1, %v787_v25  ;;  %v960_v24 = vld [vmem:[#allocation9_spill] sm:$0xff] }
 0x31c   :  { %543 = vst [vmem:[#allocation5 + $0x90] sm:$0xff] %v511_v33  ;;  %544 = vst [vmem:[#allocation5 + $0x98] sm:$0xff] %v512_v29 }
 0x31d   :  { %549 = vst [vmem:[#allocation5 + $0xc0] sm:$0xff] %v517_v34  ;;  %550 = vst [vmem:[#allocation5 + $0xc8] sm:$0xff] %v518_v44  ;;  %v476_v12 = vpop.permute.xlu1 %475  ;;  %v488_v13 = vpop.permute.xlu0 %487 }
 0x31e   :  { %v515_v45 = vmul.f32 %v476_v12, %v773_v18  ;;  %v516_v35 = vmul.f32 %v476_v12, %v957_v3  ;;  %v521_v7 = vmul.f32 %v488_v13, %v958_v40  ;;  %v522_v5 = vmul.f32 %v488_v13, %v959_v11 }
 0x320   :  { %547 = vst [vmem:[#allocation5 + $0xb0] sm:$0xff] %v515_v45  ;;  %548 = vst [vmem:[#allocation5 + $0xb8] sm:$0xff] %v516_v35 }
 0x321   :  { %553 = vst [vmem:[#allocation5 + $0xe0] sm:$0xff] %v521_v7  ;;  %554 = vst [vmem:[#allocation5 + $0xe8] sm:$0xff] %v522_v5  ;;  %v484_v6 = vpop.permute.xlu1 %483 }
 0x322   :  { %v519_v25 = vmul.f32 %v484_v6, %v960_v24  ;;  %v520_v62 = vmul.f32 %v484_v6, %v961_v46 }
 0x324   :  { %551 = vst [vmem:[#allocation5 + $0xd0] sm:$0xff] %v519_v25  ;;  %552 = vst [vmem:[#allocation5 + $0xd8] sm:$0xff] %v520_v62 }
 0x325   :  { %v492_v18 = vpop.permute.xlu1 %491 }
 0x326   :  { %v523_v22 = vmul.f32 %v492_v18, %v962_v16  ;;  %v524_v28 = vmul.f32 %v492_v18, %v963_v63 }
 0x328   :  { %555 = vst [vmem:[#allocation5 + $0xf0] sm:$0xff] %v523_v22  ;;  %556 = vst [vmem:[#allocation5 + $0xf8] sm:$0xff] %v524_v28 }
 0x329   :  { %670 = shalt.err (!%p667_p12)
}
 0x32a   :  { %s671_s6 = scalar_lea.hbm %s942_s5, 4096 }
 0x32b   :  { %p672_p13 = scmp.ne.s32.totalorder %s942_s5, %s671_s6  ;;  %p675_p0 = scmp.lt.u32.totalorder %s671_s6, %s942_s5 }
 0x32d   :  { %p677_p1 = pnand %p675_p0, %p672_p13 }
 0x32f   :  { %680 = shalt.err (!%p677_p1)
}
 0x330   :  { %568 = dma.vmem_to_hbm [thread:$0]  %s563_s3, 4096, %s942_s5, [#allocation4], %s686_s28, %s686_s28, %s687_s29  }
 0x331   :  { %683 = dma.done.wait [#allocation4], 4096  }
 0x332   :  { %684 = vsyncadd [#allocation4], 4294963200 }
 0x333   :  { %572 = vsyncpa [#allocation3], 1 }
 0x334   :  { %573 = vsyncpa [#allocation4], 1 }

</bundles_post_ra>
